<compile_context>
chip_gen: v7x
topology: tpu7x:2x2x1
jax: 0.10.0
libtpu: 0.0.40
codegen_flags: <defaults>
</compile_context>

<pallas_src>
import math

import jax
import jax.numpy as jnp
from jax.experimental import pallas as pl
from jax.experimental.pallas import tpu as pltpu


def _ffparser_kernel(x_ref, fr_ref, fi_ref, gr_ref, gi_ref, wr_ref, wi_ref, o_ref):
    # x_ref : (TR, HW)   f32  — TR flattened (batch, channel) images
    # fr/fi : (HW, HWf)  bf16 — shared rfft2 real/imag matrices (VMEM-resident)
    # gr/gi : (HWf, HW)  bf16 — shared irfft2 matrices          (VMEM-resident)
    # wr/wi : (TR, HWf)  f32  — channel-periodic spectral weights (VMEM-resident)
    # o_ref : (TR, HW)   bf16
    xb = x_ref[...].astype(jnp.bfloat16)                      # in-kernel cast (free VPU work)
    sr = jnp.dot(xb, fr_ref[...], preferred_element_type=jnp.float32)
    si = jnp.dot(xb, fi_ref[...], preferred_element_type=jnp.float32)
    wr = wr_ref[...]
    wi = wi_ref[...]
    zr = (sr * wr - si * wi).astype(jnp.bfloat16)             # complex multiply in f32
    zi = (sr * wi + si * wr).astype(jnp.bfloat16)
    y = jnp.dot(zr, gr_ref[...], preferred_element_type=jnp.float32)
    y = y + jnp.dot(zi, gi_ref[...], preferred_element_type=jnp.float32)
    o_ref[...] = y.astype(jnp.bfloat16)                       # bf16 writeback (halves store bytes)


def choose_tile_rows(B, C, HW, max_block_bytes=4 << 20):
    """Rows (flattened batch*channel images) processed per grid step.

    Must be a multiple of C (so the channel-periodic weight slab lines up for every
    block) and of 16 (bf16 sublane tiling) unless it spans the whole array.  Sized so
    the f32 input block stays <= ~4 MB (double-buffered this fits every generation's
    scoped-VMEM default, including v5e/v7x).
    """
    rows = B * C
    cap = max(1, max_block_bytes // (HW * 4))
    if rows <= cap:
        return rows                                  # small problem: single/few full blocks
    period = math.lcm(C, 16)
    tr = max(period, (cap // period) * period)
    return min(tr, rows)


def build_ffparser_tables(complex_weight, H, W, tile_rows):
    """Parameter-only preprocessing (call ONCE, outside the per-call jit).

    Returns (Fr, Fi, Gr, Gi, wrt, wit):
      Fr, Fi : (HW, HWf) bf16   x_flat @ Fr = Re(rfft2(x)),  x_flat @ Fi = Im(rfft2(x))
      Gr, Gi : (HWf, HW) bf16   irfft2(zr + i*zi)_flat = zr @ Gr + zi @ Gi   (exact, by linearity)
      wrt/wit: (tile_rows, HWf) f32 — per-channel weights tiled to the row period.
    """
    C, h, wf, two = complex_weight.shape
    assert h == H and wf == W // 2 + 1 and two == 2
    assert tile_rows % C == 0
    HW = H * W
    HWf = H * wf

    # rfft2 (ortho) applied to the pixel identity basis -> forward DFT matrices.
    basis = jnp.eye(HW, dtype=jnp.float32).reshape(HW, H, W)
    bh = jnp.fft.rfft2(basis, axes=(1, 2), norm="ortho").reshape(HW, HWf)
    Fr = jnp.real(bh).astype(jnp.bfloat16)
    Fi = jnp.imag(bh).astype(jnp.bfloat16)

    # irfft2 (ortho) applied to the real/imag frequency identity basis -> inverse matrices.
    fbasis = jnp.eye(HWf, dtype=jnp.complex64).reshape(HWf, H, wf)
    Gr = jnp.fft.irfft2(fbasis, s=(H, W), axes=(1, 2),
                        norm="ortho").reshape(HWf, HW).astype(jnp.bfloat16)
    Gi = jnp.fft.irfft2(1j * fbasis, s=(H, W), axes=(1, 2),
                        norm="ortho").reshape(HWf, HW).astype(jnp.bfloat16)

    # Channel-periodic per-row weights: row r of a block has channel r % C because every
    # block starts at a multiple of tile_rows (itself a multiple of C).
    wr = complex_weight[..., 0].reshape(C, HWf).astype(jnp.float32)
    wi = complex_weight[..., 1].reshape(C, HWf).astype(jnp.float32)
    reps = tile_rows // C
    wrt = jnp.tile(wr, (reps, 1))
    wit = jnp.tile(wi, (reps, 1))
    return Fr, Fi, Gr, Gi, wrt, wit


def _ffparser_pallas(x_rows, Fr, Fi, Gr, Gi, wrt, wit, *, tile_rows):
    BC, HW = x_rows.shape
    HWf = Fr.shape[1]
    full2d = lambda r: (0, 0)           # resident blocks: same block every step -> no re-DMA

    return pl.pallas_call(
        _ffparser_kernel,
        out_shape=jax.ShapeDtypeStruct((BC, HW), jnp.bfloat16),
        grid_spec=pltpu.PrefetchScalarGridSpec(
            num_scalar_prefetch=0,
            grid=(pl.cdiv(BC, tile_rows),),
            in_specs=[
                pl.BlockSpec((tile_rows, HW), lambda r: (r, 0)),   # x rows (natural layout)
                pl.BlockSpec((HW, HWf), full2d),                   # Fr (resident)
                pl.BlockSpec((HW, HWf), full2d),                   # Fi (resident)
                pl.BlockSpec((HWf, HW), full2d),                   # Gr (resident)
                pl.BlockSpec((HWf, HW), full2d),                   # Gi (resident)
                pl.BlockSpec((tile_rows, HWf), full2d),            # wrt (resident)
                pl.BlockSpec((tile_rows, HWf), full2d),            # wit (resident)
            ],
            out_specs=pl.BlockSpec((tile_rows, HW), lambda r: (r, 0)),
        ),
        compiler_params=pltpu.CompilerParams(
            dimension_semantics=("parallel",),          # row tiles are independent (v7x 2 TCs)
            vmem_limit_bytes=32 * 1024 * 1024,          # covers large tiles even on v5e's default
        ),
    )(x_rows, Fr, Fi, Gr, Gi, wrt, wit)


def ffparser_forward(x, Fr, Fi, Gr, Gi, wrt, wit, *, tile_rows):
    """x: (B, C, H, W); tables from build_ffparser_tables.  Returns bf16 (B, C, H, W)."""
    B, C, H, W = x.shape
    assert H == W, "height and width are not equal"     # same check as the PyTorch module
    HW = H * W
    # Free row-major flatten — no transpose, no extra HBM pass.
    x_rows = x.astype(jnp.float32).reshape(B * C, HW)
    y_rows = _ffparser_pallas(x_rows, Fr, Fi, Gr, Gi, wrt, wit, tile_rows=tile_rows)
    return y_rows.reshape(B, C, H, W)                   # bf16; cast only if the caller needs f32


if __name__ == "__main__":
    key = jax.random.PRNGKey(0)
    B, C, H, W = 2, 4, 16, 16
    Wf = W // 2 + 1

    kx, kw = jax.random.split(key)
    x = jax.random.normal(kx, (B, C, H, W), dtype=jnp.float32)
    # Deterministic synthetic parameter, matching torch.randn(dim, h, w, 2) * 0.02
    complex_weight = jax.random.normal(kw, (C, H, Wf, 2), dtype=jnp.float32) * 0.02

    # Parameter-only preprocessing: done once, outside the jitted forward (cached/reused).
    tile_rows = choose_tile_rows(B, C, H * W)
    tables = jax.block_until_ready(build_ffparser_tables(complex_weight, H, W, tile_rows))

    fwd = jax.jit(ffparser_forward, static_argnames=("tile_rows",))
    y = jax.block_until_ready(fwd(x, *tables, tile_rows=tile_rows))

    # Pure-JAX reference mirroring the PyTorch forward (rfft2 -> *w -> irfft2, ortho).
    w_complex = complex_weight[..., 0] + 1j * complex_weight[..., 1]
    x_hat = jnp.fft.rfft2(x.astype(jnp.float32), axes=(2, 3), norm="ortho")
    y_ref = jnp.fft.irfft2(x_hat * w_complex[None], s=(H, W), axes=(2, 3), norm="ortho")

    err = float(jnp.max(jnp.abs(y.astype(jnp.float32) - y_ref)))
    ref_mag = float(jnp.max(jnp.abs(y_ref)))
    assert y.shape == (B, C, H, W)
    assert err <= 1e-3 + 2e-2 * ref_mag, (err, ref_mag)
    print("KERNEL_OK")
</pallas_src>

<mosaic_0001>
module attributes {stable_mosaic.version = 11 : i64} {
  func.func @_ffparser_kernel(%arg0: i32, %arg1: memref<8x256xf32, #tpu.memory_space<vmem>>, %arg2: memref<256x144xbf16, #tpu.memory_space<vmem>>, %arg3: memref<256x144xbf16, #tpu.memory_space<vmem>>, %arg4: memref<144x256xbf16, #tpu.memory_space<vmem>>, %arg5: memref<144x256xbf16, #tpu.memory_space<vmem>>, %arg6: memref<8x144xf32, #tpu.memory_space<vmem>>, %arg7: memref<8x144xf32, #tpu.memory_space<vmem>>, %arg8: memref<8x256xbf16, #tpu.memory_space<vmem>>) attributes {dimension_semantics = [#tpu.dimension_semantics<parallel>], iteration_bounds = array<i64: 1>, scalar_prefetch = 0 : i64, scratch_operands = 0 : i64, tpu.core_type = #tpu.core_type<tc>, window_params = [{transform_indices = @transform_0, window_bounds = array<i64: 8, 256>}, {pipeline_mode = #tpu.pipeline_mode<synchronous>, transform_indices = @transform_1, window_bounds = array<i64: 256, 144>}, {pipeline_mode = #tpu.pipeline_mode<synchronous>, transform_indices = @transform_2, window_bounds = array<i64: 256, 144>}, {pipeline_mode = #tpu.pipeline_mode<synchronous>, transform_indices = @transform_3, window_bounds = array<i64: 144, 256>}, {pipeline_mode = #tpu.pipeline_mode<synchronous>, transform_indices = @transform_4, window_bounds = array<i64: 144, 256>}, {pipeline_mode = #tpu.pipeline_mode<synchronous>, transform_indices = @transform_5, window_bounds = array<i64: 8, 144>}, {pipeline_mode = #tpu.pipeline_mode<synchronous>, transform_indices = @transform_6, window_bounds = array<i64: 8, 144>}, {transform_indices = @transform_7, window_bounds = array<i64: 8, 256>}]} {
    %c0 = arith.constant 0 : index
    %c0_0 = arith.constant 0 : index
    %0 = vector.load %arg1[%c0, %c0_0] : memref<8x256xf32, #tpu.memory_space<vmem>>, vector<8x256xf32>
    %1 = arith.truncf %0 : vector<8x256xf32> to vector<8x256xbf16>
    %c0_1 = arith.constant 0 : index
    %c0_2 = arith.constant 0 : index
    %2 = vector.load %arg2[%c0_1, %c0_2] : memref<256x144xbf16, #tpu.memory_space<vmem>>, vector<256x144xbf16>
    %cst = arith.constant dense<0.000000e+00> : vector<8x144xf32>
    %3 = tpu.matmul %1, %2, %cst {dimension_numbers = #tpu.dot_dimension_numbers<[1], [0], [0], [1], [0, 0, 1, 1], [], []>} : vector<8x256xbf16>, vector<256x144xbf16>, vector<8x144xf32> -> vector<8x144xf32>
    %c0_3 = arith.constant 0 : index
    %c0_4 = arith.constant 0 : index
    %4 = vector.load %arg3[%c0_3, %c0_4] : memref<256x144xbf16, #tpu.memory_space<vmem>>, vector<256x144xbf16>
    %cst_5 = arith.constant dense<0.000000e+00> : vector<8x144xf32>
    %5 = tpu.matmul %1, %4, %cst_5 {dimension_numbers = #tpu.dot_dimension_numbers<[1], [0], [0], [1], [0, 0, 1, 1], [], []>} : vector<8x256xbf16>, vector<256x144xbf16>, vector<8x144xf32> -> vector<8x144xf32>
    %c0_6 = arith.constant 0 : index
    %c0_7 = arith.constant 0 : index
    %6 = vector.load %arg6[%c0_6, %c0_7] : memref<8x144xf32, #tpu.memory_space<vmem>>, vector<8x144xf32>
    %c0_8 = arith.constant 0 : index
    %c0_9 = arith.constant 0 : index
    %7 = vector.load %arg7[%c0_8, %c0_9] : memref<8x144xf32, #tpu.memory_space<vmem>>, vector<8x144xf32>
    %8 = arith.mulf %3, %6 : vector<8x144xf32>
    %9 = arith.mulf %5, %7 : vector<8x144xf32>
    %10 = arith.subf %8, %9 : vector<8x144xf32>
    %11 = arith.truncf %10 : vector<8x144xf32> to vector<8x144xbf16>
    %12 = arith.mulf %3, %7 : vector<8x144xf32>
    %13 = arith.mulf %5, %6 : vector<8x144xf32>
    %14 = arith.addf %12, %13 : vector<8x144xf32>
    %15 = arith.truncf %14 : vector<8x144xf32> to vector<8x144xbf16>
    %c0_10 = arith.constant 0 : index
    %c0_11 = arith.constant 0 : index
    %16 = vector.load %arg4[%c0_10, %c0_11] : memref<144x256xbf16, #tpu.memory_space<vmem>>, vector<144x256xbf16>
    %cst_12 = arith.constant dense<0.000000e+00> : vector<8x256xf32>
    %17 = tpu.matmul %11, %16, %cst_12 {dimension_numbers = #tpu.dot_dimension_numbers<[1], [0], [0], [1], [0, 0, 1, 1], [], []>} : vector<8x144xbf16>, vector<144x256xbf16>, vector<8x256xf32> -> vector<8x256xf32>
    %c0_13 = arith.constant 0 : index
    %c0_14 = arith.constant 0 : index
    %18 = vector.load %arg5[%c0_13, %c0_14] : memref<144x256xbf16, #tpu.memory_space<vmem>>, vector<144x256xbf16>
    %cst_15 = arith.constant dense<0.000000e+00> : vector<8x256xf32>
    %19 = tpu.matmul %15, %18, %cst_15 {dimension_numbers = #tpu.dot_dimension_numbers<[1], [0], [0], [1], [0, 0, 1, 1], [], []>} : vector<8x144xbf16>, vector<144x256xbf16>, vector<8x256xf32> -> vector<8x256xf32>
    %20 = arith.addf %17, %19 : vector<8x256xf32>
    %21 = arith.truncf %20 : vector<8x256xf32> to vector<8x256xbf16>
    %c0_16 = arith.constant 0 : index
    %c0_17 = arith.constant 0 : index
    %22 = vector.load %arg8[%c0_16, %c0_17] : memref<8x256xbf16, #tpu.memory_space<vmem>>, vector<8x256xbf16>
    tpu.vector_store %arg8[%c0_16, %c0_17], %21 {strides = array<i32>} : memref<8x256xbf16, #tpu.memory_space<vmem>>, vector<8x256xbf16>,
    return
  }
  func.func @transform_0(%arg0: i32) -> (i32, i32) {
    %c0_i32 = arith.constant 0 : i32
    %c0_i32_0 = arith.constant 0 : i32
    return %arg0, %c0_i32 : i32, i32
  }
  func.func @transform_1(%arg0: i32) -> (i32, i32) {
    %c0_i32 = arith.constant 0 : i32
    %c0_i32_0 = arith.constant 0 : i32
    %c0_i32_1 = arith.constant 0 : i32
    return %c0_i32, %c0_i32_0 : i32, i32
  }
  func.func @transform_2(%arg0: i32) -> (i32, i32) {
    %c0_i32 = arith.constant 0 : i32
    %c0_i32_0 = arith.constant 0 : i32
    %c0_i32_1 = arith.constant 0 : i32
    return %c0_i32, %c0_i32_0 : i32, i32
  }
  func.func @transform_3(%arg0: i32) -> (i32, i32) {
    %c0_i32 = arith.constant 0 : i32
    %c0_i32_0 = arith.constant 0 : i32
    %c0_i32_1 = arith.constant 0 : i32
    return %c0_i32, %c0_i32_0 : i32, i32
  }
  func.func @transform_4(%arg0: i32) -> (i32, i32) {
    %c0_i32 = arith.constant 0 : i32
    %c0_i32_0 = arith.constant 0 : i32
    %c0_i32_1 = arith.constant 0 : i32
    return %c0_i32, %c0_i32_0 : i32, i32
  }
  func.func @transform_5(%arg0: i32) -> (i32, i32) {
    %c0_i32 = arith.constant 0 : i32
    %c0_i32_0 = arith.constant 0 : i32
    %c0_i32_1 = arith.constant 0 : i32
    return %c0_i32, %c0_i32_0 : i32, i32
  }
  func.func @transform_6(%arg0: i32) -> (i32, i32) {
    %c0_i32 = arith.constant 0 : i32
    %c0_i32_0 = arith.constant 0 : i32
    %c0_i32_1 = arith.constant 0 : i32
    return %c0_i32, %c0_i32_0 : i32, i32
  }
  func.func @transform_7(%arg0: i32) -> (i32, i32) {
    %c0_i32 = arith.constant 0 : i32
    %c0_i32_0 = arith.constant 0 : i32
    return %arg0, %c0_i32 : i32, i32
  }
}

</mosaic_0001>

<bundles_post_ra>
// kernel: ffparser_forward.1
= control target key start
LH: loop header
LB: loop body
LE: loop exit
PB: predicated region body
PF: predicated region fallthrough
CT: control target
= control target key end

     0   :  { %vm643_vm0 = vcmask 130048   ;;  %s1452_s1 = inlined_call_operand.vmem [shape: bf16[256,144], index: 1, kind: input, shape index: {}]   ;;  %s1453_s2 = inlined_call_operand.vmem [shape: bf16[256,144], index: 2, kind: input, shape index: {}]   ;;  %s1454_s0 = inlined_call_operand.vmem [shape: f32[8,256], index: 0, kind: input, shape index: {}]   ;;  %s1455_s4 = inlined_call_operand.vmem [shape: bf16[144,256], index: 4, kind: input, shape index: {}]   ;;  %s1456_s3 = inlined_call_operand.vmem [shape: bf16[144,256], index: 3, kind: input, shape index: {}]   ;;  %s1457_s5 = inlined_call_operand.vmem [shape: f32[8,144], index: 5, kind: input, shape index: {}]   ;;  %s1458_s6 = inlined_call_operand.vmem [shape: f32[8,144], index: 6, kind: input, shape index: {}]   ;;  %s1459_s7 = inlined_call_operand.vmem [shape: bf16[8,256], index: 7, kind: output, shape index: {}]  }
   0x1   :  { %v941_v0 = vld [vmem:[%s1452_s1 + $0x4] ss:$8 sps:$4 sm:$0xff]   ;;  %v945_v2 = vld [vmem:[%s1452_s1] ss:$8 sps:$4 sm:$0xff]   ;;  %v947_v4 = vld [vmem:[%s1452_s1 + $0x14] ss:$8 sps:$4 sm:$0xff]  }
   0x2   :  { %v943_v1 = vld [vmem:[%s1453_s2 + $0x4] ss:$8 sps:$4 sm:$0xff]   ;;  %223 = vmatprep.subr.bf16.mxu0 %v941_v0  ;;  %v946_v3 = vld [vmem:[%s1453_s2] ss:$8 sps:$4 sm:$0xff]   ;;  %v949_v5 = vld [vmem:[%s1453_s2 + $0x14] ss:$8 sps:$4 sm:$0xff]  }
   0x3   :  { %456 = vmatprep.subr.bf16.mxu1 %v943_v1  ;;  %224 = vmatpush1.bf16.msra.mxu0 %v945_v2  ;;  %v951_v6 = vld [vmem:[%s1452_s1 + $0x10] ss:$8 sps:$4 sm:$0xff]   ;;  %v953_v8 = vld [vmem:[%s1452_s1 + $0x24] ss:$8 sps:$4 sm:$0xff]   ;;  %v957_v10 = vld [vmem:[%s1452_s1 + $0x20] ss:$8 sps:$4 sm:$0xff]  }
   0x4   :  { %457 = vmatpush1.bf16.msra.mxu1 %v946_v3  ;;  %225 = vmatprep.subr.bf16.mxu0 %v947_v4  ;;  %v952_v7 = vld [vmem:[%s1453_s2 + $0x10] ss:$8 sps:$4 sm:$0xff]   ;;  %v955_v9 = vld [vmem:[%s1453_s2 + $0x24] ss:$8 sps:$4 sm:$0xff]   ;;  %v958_v11 = vld [vmem:[%s1453_s2 + $0x20] ss:$8 sps:$4 sm:$0xff]  }
   0x5   :  { %458 = vmatprep.subr.bf16.mxu1 %v949_v5  ;;  %v959_v12 = vld [vmem:[%s1452_s1 + $0x34] ss:$8 sps:$4 sm:$0xff]   ;;  %v963_v14 = vld [vmem:[%s1452_s1 + $0x30] ss:$8 sps:$4 sm:$0xff]   ;;  %v965_v16 = vld [vmem:[%s1452_s1 + $0x44] ss:$8 sps:$4 sm:$0xff]  }
   0x6   :  { %v961_v13 = vld [vmem:[%s1453_s2 + $0x34] ss:$8 sps:$4 sm:$0xff]   ;;  %v964_v15 = vld [vmem:[%s1453_s2 + $0x30] ss:$8 sps:$4 sm:$0xff]   ;;  %v967_v17 = vld [vmem:[%s1453_s2 + $0x44] ss:$8 sps:$4 sm:$0xff]  }
   0x7   :  { %226 = vmatpush1.bf16.msra.mxu0 %v951_v6  ;;  %v969_v18 = vld [vmem:[%s1452_s1 + $0x40] ss:$8 sps:$4 sm:$0xff]   ;;  %v971_v20 = vld [vmem:[%s1452_s1 + $0x54] ss:$8 sps:$4 sm:$0xff]   ;;  %v975_v22 = vld [vmem:[%s1452_s1 + $0x50] ss:$8 sps:$4 sm:$0xff]  }
   0x8   :  { %459 = vmatpush1.bf16.msra.mxu1 %v952_v7  ;;  %227 = vmatprep.subr.bf16.mxu0 %v953_v8  ;;  %v970_v19 = vld [vmem:[%s1453_s2 + $0x40] ss:$8 sps:$4 sm:$0xff]   ;;  %v973_v21 = vld [vmem:[%s1453_s2 + $0x54] ss:$8 sps:$4 sm:$0xff]   ;;  %v976_v23 = vld [vmem:[%s1453_s2 + $0x50] ss:$8 sps:$4 sm:$0xff]  }
   0x9   :  { %460 = vmatprep.subr.bf16.mxu1 %v955_v9  ;;  %v977_v24 = vld [vmem:[%s1452_s1 + $0x64] ss:$8 sps:$4 sm:$0xff]   ;;  %v981_v26 = vld [vmem:[%s1452_s1 + $0x60] ss:$8 sps:$4 sm:$0xff]   ;;  %v983_v28 = vld [vmem:[%s1452_s1 + $0x74] ss:$8 sps:$4 sm:$0xff]  }
   0xa   :  { %v979_v25 = vld [vmem:[%s1453_s2 + $0x64] ss:$8 sps:$4 sm:$0xff]   ;;  %v982_v27 = vld [vmem:[%s1453_s2 + $0x60] ss:$8 sps:$4 sm:$0xff]   ;;  %v985_v29 = vld [vmem:[%s1453_s2 + $0x74] ss:$8 sps:$4 sm:$0xff]  }
   0xb   :  { %228 = vmatpush1.bf16.msra.mxu0 %v957_v10  ;;  %v987_v30 = vld [vmem:[%s1452_s1 + $0x70] ss:$8 sps:$4 sm:$0xff]   ;;  %v989_v32 = vld [vmem:[%s1452_s1 + $0x84] ss:$8 sps:$4 sm:$0xff]   ;;  %v993_v34 = vld [vmem:[%s1452_s1 + $0x80] ss:$8 sps:$4 sm:$0xff]  }
   0xc   :  { %461 = vmatpush1.bf16.msra.mxu1 %v958_v11  ;;  %229 = vmatprep.subr.bf16.mxu0 %v959_v12  ;;  %v988_v31 = vld [vmem:[%s1453_s2 + $0x70] ss:$8 sps:$4 sm:$0xff]   ;;  %v991_v33 = vld [vmem:[%s1453_s2 + $0x84] ss:$8 sps:$4 sm:$0xff]   ;;  %v994_v35 = vld [vmem:[%s1453_s2 + $0x80] ss:$8 sps:$4 sm:$0xff]  }
   0xd   :  { %462 = vmatprep.subr.bf16.mxu1 %v961_v13  ;;  %v995_v36 = vld [vmem:[%s1452_s1 + $0x94] ss:$8 sps:$4 sm:$0xff]   ;;  %v999_v38 = vld [vmem:[%s1452_s1 + $0x90] ss:$8 sps:$4 sm:$0xff]   ;;  %v1001_v40 = vld [vmem:[%s1452_s1 + $0xa4] ss:$8 sps:$4 sm:$0xff]  }
   0xe   :  { %v997_v37 = vld [vmem:[%s1453_s2 + $0x94] ss:$8 sps:$4 sm:$0xff]   ;;  %v1000_v39 = vld [vmem:[%s1453_s2 + $0x90] ss:$8 sps:$4 sm:$0xff]   ;;  %v1003_v41 = vld [vmem:[%s1453_s2 + $0xa4] ss:$8 sps:$4 sm:$0xff]  }
   0xf   :  { %230 = vmatpush1.bf16.msra.mxu0 %v963_v14  ;;  %v1005_v42 = vld [vmem:[%s1452_s1 + $0xa0] ss:$8 sps:$4 sm:$0xff]   ;;  %v1007_v44 = vld [vmem:[%s1452_s1 + $0xb4] ss:$8 sps:$4 sm:$0xff]   ;;  %v1011_v47 = vld [vmem:[%s1452_s1 + $0xb0] ss:$8 sps:$4 sm:$0xff]  }
  0x10   :  { %463 = vmatpush1.bf16.msra.mxu1 %v964_v15  ;;  %231 = vmatprep.subr.bf16.mxu0 %v965_v16  ;;  %v1006_v43 = vld [vmem:[%s1453_s2 + $0xa0] ss:$8 sps:$4 sm:$0xff]   ;;  %v1009_v45 = vld [vmem:[%s1453_s2 + $0xb4] ss:$8 sps:$4 sm:$0xff]   ;;  %v1012_v48 = vld [vmem:[%s1453_s2 + $0xb0] ss:$8 sps:$4 sm:$0xff]  }
  0x11   :  { %464 = vmatprep.subr.bf16.mxu1 %v967_v17  ;;  %v28_v46 = vld [vmem:[%s1454_s0 + $0x8] sm:$0xff]  ;;  %v1019_v54 = vld [vmem:[%s1452_s1 + $0xd4] ss:$8 sps:$4 sm:$0xff]   ;;  %v1023_v56 = vld [vmem:[%s1452_s1 + $0xd0] ss:$8 sps:$4 sm:$0xff]  }
  0x12   :  { %v30_v49 = vpack.c.bf16 %v28_v46, %v28_v46  ;;  %v1013_v50 = vld [vmem:[%s1452_s1 + $0xc4] ss:$8 sps:$4 sm:$0xff]   ;;  %v1017_v52 = vld [vmem:[%s1452_s1 + $0xc0] ss:$8 sps:$4 sm:$0xff]   ;;  %v1021_v55 = vld [vmem:[%s1453_s2 + $0xd4] ss:$8 sps:$4 sm:$0xff]  }
  0x13   :  { %232 = vmatpush1.bf16.msra.mxu0 %v969_v18  ;;  %v1015_v51 = vld [vmem:[%s1453_s2 + $0xc4] ss:$8 sps:$4 sm:$0xff]   ;;  %v1018_v53 = vld [vmem:[%s1453_s2 + $0xc0] ss:$8 sps:$4 sm:$0xff]   ;;  %v1024_v57 = vld [vmem:[%s1453_s2 + $0xd0] ss:$8 sps:$4 sm:$0xff]  }
  0x14   :  { %465 = vmatpush1.bf16.msra.mxu1 %v970_v19  ;;  %233 = vmatprep.subr.bf16.mxu0 %v971_v20  ;;  %v1025_v58 = vld [vmem:[%s1452_s1 + $0xe4] ss:$8 sps:$4 sm:$0xff]   ;;  %v1029_v60 = vld [vmem:[%s1452_s1 + $0xe0] ss:$8 sps:$4 sm:$0xff]   ;;  %v1031_v62 = vld [vmem:[%s1452_s1 + $0xf4] ss:$8 sps:$4 sm:$0xff]  }
  0x15   :  { %466 = vmatprep.subr.bf16.mxu1 %v973_v21  ;;  %255 = vmatprep.mubr.bf16.mxu0 %v30_v49  ;;  %v1027_v59 = vld [vmem:[%s1453_s2 + $0xe4] ss:$8 sps:$4 sm:$0xff]   ;;  %v1030_v61 = vld [vmem:[%s1453_s2 + $0xe0] ss:$8 sps:$4 sm:$0xff]   ;;  %v1033_v63 = vld [vmem:[%s1453_s2 + $0xf4] ss:$8 sps:$4 sm:$0xff]  }
  0x16   :  { %488 = vmatprep.mubr.bf16.mxu1 %v30_v49  ;;  %v1035_v0 = vld [vmem:[%s1452_s1 + $0xf0] ss:$8 sps:$4 sm:$0xff]   ;;  %v27_v2 = vld [vmem:[%s1454_s0] sm:$0xff]  ;;  %v1045_v8 = vld [vmem:[%s1455_s4 + $0x14] ss:$8 sps:$4 sm:$0xff]  }
  0x17   :  { %234 = vmatpush1.bf16.msra.mxu0 %v975_v22  ;;  %v1036_v1 = vld [vmem:[%s1453_s2 + $0xf0] ss:$8 sps:$4 sm:$0xff]   ;;  %v1039_v3 = vld [vmem:[%s1455_s4 + $0x4] ss:$8 sps:$4 sm:$0xff]   ;;  %v1037_v5 = vld [vmem:[%s1455_s4] ss:$8 sps:$4 sm:$0xff]   ;;  %v29_v6 = vpack.c.bf16 %v27_v2, %v27_v2 }
  0x18   :  { %467 = vmatpush1.bf16.msra.mxu1 %v976_v23  ;;  %235 = vmatprep.subr.bf16.mxu0 %v977_v24  ;;  %v1042_v4 = vld [vmem:[%s1456_s3 + $0x4] ss:$8 sps:$4 sm:$0xff]   ;;  %v1040_v7 = vld [vmem:[%s1456_s3] ss:$8 sps:$4 sm:$0xff]   ;;  %v1048_v9 = vld [vmem:[%s1456_s3 + $0x14] ss:$8 sps:$4 sm:$0xff]  }
  0x19   :  { %468 = vmatprep.subr.bf16.mxu1 %v979_v25  ;;  %v1043_v10 = vld [vmem:[%s1455_s4 + $0x10] ss:$8 sps:$4 sm:$0xff]   ;;  %v1051_v12 = vld [vmem:[%s1455_s4 + $0x24] ss:$8 sps:$4 sm:$0xff]   ;;  %v1049_v14 = vld [vmem:[%s1455_s4 + $0x20] ss:$8 sps:$4 sm:$0xff]  }
  0x1a   :  { %v1046_v11 = vld [vmem:[%s1456_s3 + $0x10] ss:$8 sps:$4 sm:$0xff]   ;;  %v1054_v13 = vld [vmem:[%s1456_s3 + $0x24] ss:$8 sps:$4 sm:$0xff]   ;;  %v1052_v15 = vld [vmem:[%s1456_s3 + $0x20] ss:$8 sps:$4 sm:$0xff]  }
  0x1b   :  { %236 = vmatpush1.bf16.msra.mxu0 %v981_v26  ;;  %v1057_v16 = vld [vmem:[%s1455_s4 + $0x34] ss:$8 sps:$4 sm:$0xff]   ;;  %v1055_v18 = vld [vmem:[%s1455_s4 + $0x30] ss:$8 sps:$4 sm:$0xff]   ;;  %v1063_v20 = vld [vmem:[%s1455_s4 + $0x44] ss:$8 sps:$4 sm:$0xff]  }
  0x1c   :  { %469 = vmatpush1.bf16.msra.mxu1 %v982_v27  ;;  %237 = vmatprep.subr.bf16.mxu0 %v983_v28  ;;  %v1060_v17 = vld [vmem:[%s1456_s3 + $0x34] ss:$8 sps:$4 sm:$0xff]   ;;  %v1058_v19 = vld [vmem:[%s1456_s3 + $0x30] ss:$8 sps:$4 sm:$0xff]   ;;  %v1066_v21 = vld [vmem:[%s1456_s3 + $0x44] ss:$8 sps:$4 sm:$0xff]  }
  0x1d   :  { %470 = vmatprep.subr.bf16.mxu1 %v985_v29  ;;  %v1061_v22 = vld [vmem:[%s1455_s4 + $0x40] ss:$8 sps:$4 sm:$0xff]   ;;  %v1069_v24 = vld [vmem:[%s1455_s4 + $0x54] ss:$8 sps:$4 sm:$0xff]   ;;  %v1067_v26 = vld [vmem:[%s1455_s4 + $0x50] ss:$8 sps:$4 sm:$0xff]  }
  0x1e   :  { %v1064_v23 = vld [vmem:[%s1456_s3 + $0x40] ss:$8 sps:$4 sm:$0xff]   ;;  %v1072_v25 = vld [vmem:[%s1456_s3 + $0x54] ss:$8 sps:$4 sm:$0xff]   ;;  %v1070_v27 = vld [vmem:[%s1456_s3 + $0x50] ss:$8 sps:$4 sm:$0xff]  }
  0x1f   :  { %238 = vmatpush1.bf16.msra.mxu0 %v987_v30  ;;  %v1075_v28 = vld [vmem:[%s1455_s4 + $0x64] ss:$8 sps:$4 sm:$0xff]   ;;  %v1073_v30 = vld [vmem:[%s1455_s4 + $0x60] ss:$8 sps:$4 sm:$0xff]  }
  0x20   :  { %471 = vmatpush1.bf16.msra.mxu1 %v988_v31  ;;  %239 = vmatprep.subr.bf16.mxu0 %v989_v32  ;;  %v1078_v29 = vld [vmem:[%s1456_s3 + $0x64] ss:$8 sps:$4 sm:$0xff]   ;;  %v1076_v31 = vld [vmem:[%s1456_s3 + $0x60] ss:$8 sps:$4 sm:$0xff]   ;;  %v1081_v32 = vld [vmem:[%s1455_s4 + $0x74] ss:$8 sps:$4 sm:$0xff]  }
  0x21   :  { %472 = vmatprep.subr.bf16.mxu1 %v991_v33  ;;  %v1084_v33 = vld [vmem:[%s1456_s3 + $0x74] ss:$8 sps:$4 sm:$0xff]  }
  0x23   :  { %240 = vmatpush1.bf16.msra.mxu0 %v993_v34  ;;  %v1079_v34 = vld [vmem:[%s1455_s4 + $0x70] ss:$8 sps:$4 sm:$0xff]  }
  0x24   :  { %473 = vmatpush1.bf16.msra.mxu1 %v994_v35  ;;  %241 = vmatprep.subr.bf16.mxu0 %v995_v36  ;;  %v1082_v35 = vld [vmem:[%s1456_s3 + $0x70] ss:$8 sps:$4 sm:$0xff]   ;;  %v1087_v36 = vld [vmem:[%s1455_s4 + $0x84] ss:$8 sps:$4 sm:$0xff]  }
  0x25   :  { %474 = vmatprep.subr.bf16.mxu1 %v997_v37  ;;  %v1090_v37 = vld [vmem:[%s1456_s3 + $0x84] ss:$8 sps:$4 sm:$0xff]  }
  0x27   :  { %242 = vmatpush1.bf16.msra.mxu0 %v999_v38  ;;  %v1085_v38 = vld [vmem:[%s1455_s4 + $0x80] ss:$8 sps:$4 sm:$0xff]  }
  0x28   :  { %475 = vmatpush1.bf16.msra.mxu1 %v1000_v39  ;;  %243 = vmatprep.subr.bf16.mxu0 %v1001_v40  ;;  %v1088_v39 = vld [vmem:[%s1456_s3 + $0x80] ss:$8 sps:$4 sm:$0xff]  }
  0x29   :  { %476 = vmatprep.subr.bf16.mxu1 %v1003_v41  ;;  %v497_v40 = vld [vmem:[%s1457_s5] sm:$0xff] }
  0x2a   :  { %v499_v41 = vld [vmem:[%s1458_s6] sm:$0xff] }
  0x2b   :  { %244 = vmatpush1.bf16.msra.mxu0 %v1005_v42  ;;  %v498_v42 = vld [vmem:[%s1457_s5 + $0x8] sm:$0xff] }
  0x2c   :  { %477 = vmatpush1.bf16.msra.mxu1 %v1006_v43  ;;  %245 = vmatprep.subr.bf16.mxu0 %v1007_v44  ;;  %v500_v43 = vld [vmem:[%s1458_s6 + $0x8] sm:$0xff] }
  0x2d   :  { %478 = vmatprep.subr.bf16.mxu1 %v1009_v45 }
  0x2f   :  { %246 = vmatpush1.bf16.msra.mxu0 %v1011_v47 }
  0x30   :  { %479 = vmatpush1.bf16.msra.mxu1 %v1012_v48  ;;  %247 = vmatprep.subr.bf16.mxu0 %v1013_v50 }
  0x31   :  { %480 = vmatprep.subr.bf16.mxu1 %v1015_v51 }
  0x33   :  { %248 = vmatpush1.bf16.msra.mxu0 %v1017_v52 }
  0x34   :  { %481 = vmatpush1.bf16.msra.mxu1 %v1018_v53  ;;  %249 = vmatprep.subr.bf16.mxu0 %v1019_v54 }
  0x35   :  { %482 = vmatprep.subr.bf16.mxu1 %v1021_v55 }
  0x37   :  { %250 = vmatpush1.bf16.msra.mxu0 %v1023_v56 }
  0x38   :  { %483 = vmatpush1.bf16.msra.mxu1 %v1024_v57  ;;  %251 = vmatprep.subr.bf16.mxu0 %v1025_v58 }
  0x39   :  { %484 = vmatprep.subr.bf16.mxu1 %v1027_v59 }
  0x3b   :  { %252 = vmatpush1.bf16.msra.mxu0 %v1029_v60 }
  0x3c   :  { %485 = vmatpush1.bf16.msra.mxu1 %v1030_v61  ;;  %253 = vmatprep.subr.bf16.mxu0 %v1031_v62 }
  0x3d   :  { %486 = vmatprep.subr.bf16.mxu1 %v1033_v63 }
  0x3f   :  { %254 = vmatpush1.bf16.msra.mxu0 %v1035_v0 }
  0x40   :  { %487 = vmatpush1.bf16.msra.mxu1 %v1036_v1  ;;  %781 = vmatprep.subr.bf16.mxu0 %v1042_v4 }
  0x41   :  { %647 = vmatprep.subr.bf16.mxu1 %v1039_v3 }
  0x42   :  { %256 = vmatmul.mubr.bf16.vlgmr.msra.gmra.mrb[0].mxu0 %v29_v6 }
  0x43   :  { %489 = vmatmul.mubr.bf16.vlgmr.msra.gmra.mrb[0].mxu1 %v29_v6  ;;  %782 = vmatpush1.bf16.msra.mxu0 %v1040_v7 }
  0x44   :  { %648 = vmatpush1.bf16.msra.mxu1 %v1037_v5  ;;  %783 = vmatprep.subr.bf16.mxu0 %v1048_v9 }
  0x45   :  { %649 = vmatprep.subr.bf16.mxu1 %v1045_v8 }
  0x47   :  { %784 = vmatpush1.bf16.msra.mxu0 %v1046_v11 }
  0x48   :  { %650 = vmatpush1.bf16.msra.mxu1 %v1043_v10  ;;  %785 = vmatprep.subr.bf16.mxu0 %v1054_v13 }
  0x49   :  { %651 = vmatprep.subr.bf16.mxu1 %v1051_v12 }
  0x4b   :  { %786 = vmatpush1.bf16.msra.mxu0 %v1052_v15 }
  0x4c   :  { %652 = vmatpush1.bf16.msra.mxu1 %v1049_v14  ;;  %787 = vmatprep.subr.bf16.mxu0 %v1060_v17 }
  0x4d   :  { %653 = vmatprep.subr.bf16.mxu1 %v1057_v16 }
  0x4f   :  { %788 = vmatpush1.bf16.msra.mxu0 %v1058_v19 }
  0x50   :  { %654 = vmatpush1.bf16.msra.mxu1 %v1055_v18  ;;  %789 = vmatprep.subr.bf16.mxu0 %v1066_v21 }
  0x51   :  { %655 = vmatprep.subr.bf16.mxu1 %v1063_v20 }
  0x53   :  { %790 = vmatpush1.bf16.msra.mxu0 %v1064_v23 }
  0x54   :  { %656 = vmatpush1.bf16.msra.mxu1 %v1061_v22  ;;  %791 = vmatprep.subr.bf16.mxu0 %v1072_v25 }
  0x55   :  { %657 = vmatprep.subr.bf16.mxu1 %v1069_v24 }
  0x57   :  { %792 = vmatpush1.bf16.msra.mxu0 %v1070_v27 }
  0x58   :  { %658 = vmatpush1.bf16.msra.mxu1 %v1067_v26  ;;  %793 = vmatprep.subr.bf16.mxu0 %v1078_v29 }
  0x59   :  { %659 = vmatprep.subr.bf16.mxu1 %v1075_v28 }
  0x5b   :  { %794 = vmatpush1.bf16.msra.mxu0 %v1076_v31 }
  0x5c   :  { %660 = vmatpush1.bf16.msra.mxu1 %v1073_v30  ;;  %795 = vmatprep.subr.bf16.mxu0 %v1084_v33 }
  0x5d   :  { %661 = vmatprep.subr.bf16.mxu1 %v1081_v32 }
  0x5f   :  { %796 = vmatpush1.bf16.msra.mxu0 %v1082_v35 }
  0x60   :  { %662 = vmatpush1.bf16.msra.mxu1 %v1079_v34  ;;  %797 = vmatprep.subr.bf16.mxu0 %v1090_v37 }
  0x61   :  { %663 = vmatprep.subr.bf16.mxu1 %v1087_v36 }
  0x63   :  { %798 = vmatpush1.bf16.msra.mxu0 %v1088_v39 }
  0x64   :  { %664 = vmatpush1.bf16.msra.mxu1 %v1085_v38 }
 0x115   :  { %v257_v44 = vpop.f32.mrb[0].mxu0 }
 0x116   :  { %v490_v45 = vpop.f32.mrb[0].mxu1  ;;  %v501_v46 = vmul.f32 %v497_v40, %v257_v44  ;;  %v509_v47 = vmul.f32 %v499_v41, %v257_v44  ;;  %v259_v50 = vpop.f32.mrb[1].mxu0 }
 0x117   :  { %v503_v48 = vmul.f32 %v499_v41, %v490_v45  ;;  %v511_v49 = vmul.f32 %v497_v40, %v490_v45  ;;  %v492_v51 = vpop.f32.mrb[1].mxu1  ;;  %v502_v52 = vmul.f32 %v498_v42, %v259_v50  ;;  %v510_v53 = vmul.f32 %v500_v43, %v259_v50  ;;  %v261_v56 = vpop.f32.mrb[2].mxu0 }
 0x118   :  { %v504_v54 = vmul.f32 %v500_v43, %v492_v51  ;;  %v512_v55 = vmul.f32 %v498_v42, %v492_v51  ;;  %v494_v57 = vpop.f32.mrb[2].mxu1  ;;  %v262_v60 = vpop.f32.mrb[3].mxu0 }
 0x119   :  { %v505_v58 = vsub.f32 %v501_v46, %v503_v48  ;;  %v513_v59 = vadd.f32 %v511_v49, %v509_v47  ;;  %v495_v61 = vpop.f32.mrb[3].mxu1 }
 0x11a   :  { %v506_v62 = vsub.f32 %v502_v52, %v504_v54  ;;  %v514_v63 = vadd.f32 %v512_v55, %v510_v53 }
 0x11b   :  { %v507_v2 = vpack.c.bf16 %v505_v58, %v505_v58  ;;  %v515_v3 = vpack.c.bf16 %v513_v59, %v513_v59 }
 0x11c   :  { %v508_v0 = vpack.c.bf16 %v506_v62, %v506_v62  ;;  %v516_v1 = vpack.c.bf16 %v514_v63, %v514_v63 }
 0x11e   :  { %917 = vmatprep.mubr.msk.bf16.mxu1 %vm643_vm0, %v516_v1  ;;  %936 = vmatprep.mubr.msk.bf16.mxu0 %vm643_vm0, %v508_v0 }
 0x11f   :  { %680 = vmatmul.mubr.bf16.vlgmr.msra.gmra.mrb[4].mxu1 %v515_v3  ;;  %814 = vmatmul.mubr.bf16.vlgmr.msra.gmra.mrb[4].mxu0 %v507_v2 }
 0x1f2   :  { %v681_v4 = vpop.f32.mrb[4].mxu1  ;;  %v815_v5 = vpop.f32.mrb[4].mxu0 }
 0x1f3   :  { %v816_v6 = vadd.f32 %v815_v5, %v681_v4  ;;  %v683_v7 = vpop.f32.mrb[5].mxu1  ;;  %v817_v8 = vpop.f32.mrb[5].mxu0 }
 0x1f4   :  { %v818_v9 = vadd.f32 %v817_v8, %v683_v7  ;;  %v685_v10 = vpop.f32.mrb[6].mxu1  ;;  %v819_v11 = vpop.f32.mrb[6].mxu0 }
 0x1f5   :  { %v686_v12 = vpop.f32.mrb[7].mxu1  ;;  %v820_v13 = vpop.f32.mrb[7].mxu0 }
 0x1f6   :  { %v938_v14 = vpack.c.bf16 %v818_v9, %v816_v6 }
 0x1f8   :  { %830 = vst [vmem:[%s1459_s7] sm:$0xff] %v938_v14 }

</bundles_post_ra>
